<compile_context>
chip_gen: v7x
topology: tpu7x:2x2x1
jax: 0.10.0
libtpu: 0.0.40
codegen_flags: <defaults>
</compile_context>

<pallas_src>
import functools

import jax
import jax.numpy as jnp
from jax import lax
from jax.experimental import pallas as pl
from jax.experimental.pallas import tpu as pltpu


def _round_up(x, m):
    return ((x + m - 1) // m) * m


def _sublane(dtype):
    itemsize = jnp.dtype(dtype).itemsize
    return {4: 8, 2: 16, 1: 32}.get(itemsize, 8)


def _choose_tm(rows, tm_default, sublane, *, min_rows=512, target_steps=4):
    """Row-tile selection: large enough to amortize the ~0.35us per-grid-step
    overhead, small enough to keep >= target_steps grid steps (megacore
    sharding on v7x + DMA/compute overlap) and to stay inside VMEM."""
    tm = max(sublane, min(tm_default, rows))
    if rows >= target_steps * min_rows:
        tm = min(tm, max(min_rows, pl.cdiv(rows, target_steps)))
    tm = _round_up(tm, sublane)
    if pl.cdiv(rows, tm) <= 1:
        # Single block: use the full extent (alignment not required then).
        return rows
    return tm


def _linear_proj_kernel(x_ref, w_ref, o_ref):
    # x_ref: (TM, 1) f32, w_ref: (1, E) f32, o_ref: (TM, E) out_dtype.
    # in_features == 1 -> exact VPU broadcast multiply (no MXU).
    o_ref[...] = (x_ref[...] * w_ref[...]).astype(o_ref.dtype)


def _linear_proj_packed_kernel(x_ref, w_ref, o_ref, *, e, pack):
    # Lane-dense variant: each output row packs `pack` consecutive original
    # rows so the store lane-width is 128 (unmasked full-vreg stores).
    # x_ref: (TMp, pack) f32, w_ref: (1, pack*e) tiled weight,
    # o_ref: (TMp, pack*e) out_dtype.  pack <= 4 (gated by the wrapper).
    rows, lanes = o_ref.shape
    # (1, lanes) lane index; jnp.where broadcasts it over sublanes (avoids a
    # full (rows, lanes) int32 materialization per grid step).
    lane = lax.broadcasted_iota(jnp.int32, (1, lanes), 1)
    x_exp = jnp.broadcast_to(x_ref[:, 0:1], (rows, lanes))
    for i in range(1, pack):
        x_exp = jnp.where(
            lane >= i * e,
            jnp.broadcast_to(x_ref[:, i:i + 1], (rows, lanes)),
            x_exp,
        )
    o_ref[...] = (x_exp * w_ref[...]).astype(o_ref.dtype)


def linear_proj_forward(x, t, weight, *, out_dtype=jnp.float32,
                        block_rows=None, use_pallas=None):
    """Pallas equivalent of LinearProj.forward(x, t).

    x:         (B, T, 1) float32
    t:         unused (interface parity with the PyTorch module)
    weight:    (E, 1) float32 -- nn.Linear(1, E, bias=False).weight
    out_dtype: output dtype; f32 (default) matches PyTorch exactly; bf16
               halves HBM writeback bytes (only divergence is final rounding).
    returns    (B, T, E) out_dtype
    """
    del t  # forward() ignores t
    B, T, in_features = x.shape
    assert in_features == 1, "LinearProj uses in_features == 1"
    E = weight.shape[0]
    M = B * T
    out_dtype = jnp.dtype(out_dtype)
    out_itemsize = out_dtype.itemsize
    sub = _sublane(out_dtype)

    x_flat = x.reshape(M, 1).astype(jnp.float32)
    w_t = weight.reshape(1, E).astype(jnp.float32)  # W^T: (1, E)

    # Tiny problems: launch + pipeline prologue/epilogue dominate; let XLA
    # fuse the broadcast mul instead (threshold raised per perf review).
    if use_pallas is None:
        use_pallas = (M * E) >= (1 << 21)
    if not use_pallas:
        return (x_flat * w_t).astype(out_dtype).reshape(B, T, E)

    cost = pl.CostEstimate(
        flops=M * E,
        transcendentals=0,
        bytes_accessed=4 * M + 4 * E + out_itemsize * M * E,
    )

    pack = 128 // E if (E < 128 and 128 % E == 0) else 1

    if 1 < pack <= 4 and M % pack == 0:
        # Lane-dense packed path (E in {32, 64}); output slab (M/pack, 128)
        # reshapes back to (M, E) for free (contiguous).
        Mp = M // pack
        lanes = E * pack  # == 128
        if block_rows is not None:
            tm_default = block_rows
        else:
            # ~2 MiB output block.
            tm_default = max(512, min(8192, (2 << 20) // (lanes * out_itemsize)))
        tm = _choose_tm(Mp, tm_default, sub)
        grid = (pl.cdiv(Mp, tm),)

        x_in = x_flat.reshape(Mp, pack)
        w_in = jnp.tile(w_t, (1, pack))  # (1, 128)

        # VMEM budget: double-buffered output block + double-buffered x block
        # (lane-padded to 128 lanes!) + weight + headroom.
        out_blk = tm * lanes * out_itemsize
        x_blk = tm * 128 * 4
        vmem_limit = int(2 * out_blk + 2 * x_blk + 2 * 8 * 128 * 4 + (4 << 20))

        kernel = functools.partial(_linear_proj_packed_kernel, e=E, pack=pack)
        out_flat = pl.pallas_call(
            kernel,
            out_shape=jax.ShapeDtypeStruct((Mp, lanes), out_dtype),
            grid_spec=pltpu.PrefetchScalarGridSpec(
                num_scalar_prefetch=0,
                grid=grid,
                in_specs=[
                    pl.BlockSpec((tm, pack), lambda i: (i, 0)),
                    pl.BlockSpec((1, lanes), lambda i: (0, 0)),
                ],
                out_specs=pl.BlockSpec((tm, lanes), lambda i: (i, 0)),
            ),
            compiler_params=pltpu.CompilerParams(
                dimension_semantics=("parallel",),
                vmem_limit_bytes=vmem_limit),
            cost_estimate=cost,
        )(x_in, w_in)
        return out_flat.reshape(B, T, E)

    # Simple tiled path: (TM, E) output blocks, ~2 MiB per block.
    E_pad = _round_up(E, 128)
    if block_rows is not None:
        tm_default = block_rows
    else:
        tm_default = max(512, min(8192, (2 << 20) // max(1, E_pad * out_itemsize)))
    tm = _choose_tm(M, tm_default, sub)
    grid = (pl.cdiv(M, tm),)

    out_blk = tm * E_pad * out_itemsize
    x_blk = tm * 128 * 4  # (tm, 1) f32 block is lane-padded to 128 lanes
    vmem_limit = int(2 * out_blk + 2 * x_blk + 2 * 8 * E_pad * 4 + (4 << 20))

    out_flat = pl.pallas_call(
        _linear_proj_kernel,
        out_shape=jax.ShapeDtypeStruct((M, E), out_dtype),
        grid_spec=pltpu.PrefetchScalarGridSpec(
            num_scalar_prefetch=0,
            grid=grid,
            in_specs=[
                pl.BlockSpec((tm, 1), lambda i: (i, 0)),
                pl.BlockSpec((1, E), lambda i: (0, 0)),
            ],
            out_specs=pl.BlockSpec((tm, E), lambda i: (i, 0)),
        ),
        compiler_params=pltpu.CompilerParams(
            dimension_semantics=("parallel",),
            vmem_limit_bytes=vmem_limit),
        cost_estimate=cost,
    )(x_flat, w_t)
    return out_flat.reshape(B, T, E)


def make_linear_proj_params(key, embedding_size=64, input_size=1):
    """Synthetic init mimicking nn.Linear(1, E, bias=False):
    weight ~ U(-1/sqrt(in_features), 1/sqrt(in_features))."""
    bound = 1.0 / jnp.sqrt(jnp.float32(input_size))
    return jax.random.uniform(
        key, (embedding_size, input_size), dtype=jnp.float32,
        minval=-bound, maxval=bound,
    )


# TODO(synk): time_proj() (sin/cos positional transform) and the even/odd
# buffers are dead code in the PyTorch forward, so they are not lowered.


if __name__ == "__main__":
    key = jax.random.PRNGKey(0)
    k_w, k_x, k_t, k_w2 = jax.random.split(key, 4)

    B, T, E = 2, 8, 64
    weight = make_linear_proj_params(k_w, embedding_size=E, input_size=1)
    x = jax.random.normal(k_x, (B, T, 1), dtype=jnp.float32)
    t = jax.random.uniform(k_t, (B, T, 1), dtype=jnp.float32) * 1000.0  # unused

    ref = jnp.einsum("btk,ek->bte", x, weight)

    # Packed lane-dense path (E=64 -> pack=2), f32 output (matches PyTorch).
    out = jax.block_until_ready(
        linear_proj_forward(x, t, weight, use_pallas=True))
    assert out.shape == (B, T, E)
    assert jnp.allclose(out, ref, atol=1e-6, rtol=1e-6)

    # Simple tiled path (E=128 -> already lane-dense).
    E2 = 128
    weight2 = make_linear_proj_params(k_w2, embedding_size=E2, input_size=1)
    out2 = jax.block_until_ready(
        linear_proj_forward(x, t, weight2, use_pallas=True))
    ref2 = jnp.einsum("btk,ek->bte", x, weight2)
    assert out2.shape == (B, T, E2)
    assert jnp.allclose(out2, ref2, atol=1e-6, rtol=1e-6)

    # Optional bf16-output variant (halves HBM writeback; diverges from the
    # f32 reference only by the final rounding of the store).
    out_bf16 = jax.block_until_ready(
        linear_proj_forward(x, t, weight, out_dtype=jnp.bfloat16,
                            use_pallas=True))
    assert out_bf16.dtype == jnp.bfloat16
    assert jnp.allclose(out_bf16.astype(jnp.float32), ref, atol=2e-2, rtol=2e-2)

    print("KERNEL_OK")
</pallas_src>

<mosaic_0001>
module attributes {stable_mosaic.version = 11 : i64} {
  func.func @_linear_proj_packed_kernel(%arg0: i32, %arg1: memref<8x2xf32, #tpu.memory_space<vmem>>, %arg2: memref<1x128xf32, #tpu.memory_space<vmem>>, %arg3: memref<8x128xf32, #tpu.memory_space<vmem>>) attributes {dimension_semantics = [#tpu.dimension_semantics<parallel>], iteration_bounds = array<i64: 1>, scalar_prefetch = 0 : i64, scratch_operands = 0 : i64, tpu.core_type = #tpu.core_type<tc>, window_params = [{transform_indices = @transform_0, window_bounds = array<i64: 8, 2>}, {pipeline_mode = #tpu.pipeline_mode<synchronous>, transform_indices = @transform_1, window_bounds = array<i64: 1, 128>}, {transform_indices = @transform_2, window_bounds = array<i64: 8, 128>}]} {
    %0 = tpu.iota {dimensions = array<i32: 1>} : vector<1x128xi32>
    %c0 = arith.constant 0 : index
    %c0_0 = arith.constant 0 : index
    %1 = vector.load %arg1[%c0, %c0_0] : memref<8x2xf32, #tpu.memory_space<vmem>>, vector<8x1xf32>
    %2 = vector.shape_cast %1 : vector<8x1xf32> to vector<8x1xf32>
    %3 = vector.broadcast %2 : vector<8x1xf32> to vector<8x128xf32>
    %c64_i32 = arith.constant 64 : i32
    %4 = vector.broadcast %c64_i32 : i32 to vector<1x128xi32>
    %5 = arith.cmpi sge, %0, %4 : vector<1x128xi32>
    %c0_1 = arith.constant 0 : index
    %c1 = arith.constant 1 : index
    %6 = vector.load %arg1[%c0_1, %c1] : memref<8x2xf32, #tpu.memory_space<vmem>>, vector<8x1xf32>
    %7 = vector.shape_cast %6 : vector<8x1xf32> to vector<8x1xf32>
    %8 = vector.broadcast %7 : vector<8x1xf32> to vector<8x128xf32>
    %9 = vector.shape_cast %5 : vector<1x128xi1> to vector<1x128xi1>
    %10 = vector.broadcast %9 : vector<1x128xi1> to vector<8x128xi1>
    %11 = arith.select %10, %8, %3 : vector<8x128xi1>, vector<8x128xf32>
    %c0_2 = arith.constant 0 : index
    %c0_3 = arith.constant 0 : index
    %12 = vector.load %arg2[%c0_2, %c0_3] : memref<1x128xf32, #tpu.memory_space<vmem>>, vector<1x128xf32>
    %13 = vector.broadcast %12 : vector<1x128xf32> to vector<8x128xf32>
    %14 = arith.mulf %11, %13 : vector<8x128xf32>
    %c0_4 = arith.constant 0 : index
    %c0_5 = arith.constant 0 : index
    %15 = vector.load %arg3[%c0_4, %c0_5] : memref<8x128xf32, #tpu.memory_space<vmem>>, vector<8x128xf32>
    tpu.vector_store %arg3[%c0_4, %c0_5], %14 {strides = array<i32>} : memref<8x128xf32, #tpu.memory_space<vmem>>, vector<8x128xf32>,
    return
  }
  func.func @transform_0(%arg0: i32) -> (i32, i32) {
    %c0_i32 = arith.constant 0 : i32
    %c0_i32_0 = arith.constant 0 : i32
    return %arg0, %c0_i32 : i32, i32
  }
  func.func @transform_1(%arg0: i32) -> (i32, i32) {
    %c0_i32 = arith.constant 0 : i32
    %c0_i32_0 = arith.constant 0 : i32
    %c0_i32_1 = arith.constant 0 : i32
    return %c0_i32, %c0_i32_0 : i32, i32
  }
  func.func @transform_2(%arg0: i32) -> (i32, i32) {
    %c0_i32 = arith.constant 0 : i32
    %c0_i32_0 = arith.constant 0 : i32
    return %arg0, %c0_i32 : i32, i32
  }
}

</mosaic_0001>

<bundles_post_ra>
// kernel: tpu_custom_call.1
= control target key start
LH: loop header
LB: loop body
LE: loop exit
PB: predicated region body
PF: predicated region fallthrough
CT: control target
= control target key end

     0   :  { %s117_s0 = inlined_call_operand.vmem [shape: f32[8,2], index: 0, kind: input, shape index: {}]   ;;  %s118_s1 = inlined_call_operand.vmem [shape: f32[1,128], index: 1, kind: input, shape index: {}]   ;;  %s119_s2 = inlined_call_operand.hbm [shape: f32[8,128], index: 2, kind: output, shape index: {}]  }
   0x1   :  { %v14_v0 = vld [vmem:[%s117_s0] sm:$0xff] }
   0x2   :  { %7 = vsyncpa [#allocation3], 0  ;;  %v81_v1 = vmov 0   ;;  %v82_v2 = vmov 1   ;;  %v12_v3 = vlaneseq  ;;  %v51_v6 = vld [vmem:[%s118_s1] ss:$0 sm:$0xff] }
   0x3   :  { %55 = vset.pattern.permute.xlu0 %v81_v1  ;;  %s83_s13 = smov [#allocation2]  }
   0x4   :  { %17 = vperm.xlu0 %55, %v14_v0   ;;  %v13_v4 = vand.u32 127, %v12_v3  ;;  %s43_s14 = sshll.u32 %s83_s13, 4  ;;  %s44_s14 = int_to_ptr.vmem [resolvable:$true] %s43_s14 }
   0x5   :  { %s57_s0 = scalar_lea.vmem %s44_s14, 128  ;;  %p62_p1 = scmp.lt.s32.totalorder %s44_s14, %s44_s14 }
   0x6   :  { %vm20_vm0 = vcmp.ge.s32.totalorder %v13_v4, 64  ;;  %p58_p0 = scmp.ne.s32.totalorder %s44_s14, %s57_s0  ;;  %p63_p2 = scmp.lt.s32.totalorder %s57_s0, %s57_s0 }
   0x8   :  { %56 = vset.pattern.permute.xlu0 %v82_v2  ;;  %p64_p3 = por %p63_p2, %p62_p1 }
   0x9   :  { %22 = vperm.xlu0 %56, %v14_v0  }
   0xa   :  { %p65_p4 = pnand %p64_p3, %p58_p0 }
  0x83   :  { %v18_v5 = vpop.permute.xlu0 %17 }
  0x88   :  { %v23_v7 = vpop.permute.xlu0 %22 }
  0x89   :  { %v27_v8 = vsel %vm20_vm0, %v23_v7, %v18_v5 }
  0x8a   :  { %v35_v9 = vmul.f32 %v51_v6, %v27_v8 }
  0x8c   :  { %36 = vst [vmem:[#allocation2] sm:$0xff] %v35_v9 }
  0x8d   :  { %68 = shalt.err (!%p65_p4)
}
  0x8e   :  { %s69_s17 = scalar_lea.hbm %s119_s2, 128 }
  0x8f   :  { %p70_p5 = scmp.ne.s32.totalorder %s119_s2, %s69_s17  ;;  %p73_p6 = scmp.lt.u32.totalorder %s69_s17, %s119_s2 }
  0x91   :  { %p75_p7 = pnand %p73_p6, %p70_p5 }
  0x93   :  { %78 = shalt.err (!%p75_p7)
}
  0x94   :  { %46 = dma.vmem_to_hbm [thread:$0]  %s44_s14, 128, %s119_s2, [#allocation3]  }
  0x95   :  { %79 = dma.done.wait [#allocation3], 128  }
  0x96   :  { %80 = vsyncadd [#allocation3], 4294967168 }
  0x97   :  { %50 = vsyncpa [#allocation3], 1 }

</bundles_post_ra>
